<compile_context>
chip_gen: v5e
topology: v5e:2x2
jax: 0.10.0
libtpu: 0.0.40
codegen_flags: <defaults>
</compile_context>

<pallas_src>
from functools import partial

import jax
import jax.numpy as jnp
from jax.experimental import pallas as pl
from jax.experimental.pallas import tpu as pltpu


def _double_conv_kernel(x_ref, w1_ref, b1_ref, w2_ref, b2_ref, o_ref,
                        xpad_ref, mpad_ref, *, H, W, Cin, Cmid, Cout):
    """One batch image: (3x3 'same' conv -> bias -> ReLU) twice, fully lane-dense."""
    f32 = jnp.float32

    # ---- stage the input into a lane-dense padded slab (halo-only zeroing) ----
    xpad_ref[0:1, :] = jnp.zeros((1, (W + 2) * Cin), xpad_ref.dtype)
    xpad_ref[H + 1:H + 2, :] = jnp.zeros((1, (W + 2) * Cin), xpad_ref.dtype)
    xpad_ref[:, 0:Cin] = jnp.zeros((H + 2, Cin), xpad_ref.dtype)
    xpad_ref[:, (W + 1) * Cin:] = jnp.zeros((H + 2, Cin), xpad_ref.dtype)
    xpad_ref[1:H + 1, Cin:(W + 1) * Cin] = x_ref[0].astype(xpad_ref.dtype)

    # ---- layer 1: 3 lane-dense MXU matmuls (one per row tap dy), f32 accum ----
    y1 = jnp.dot(xpad_ref[0:H, :], w1_ref[0], preferred_element_type=f32)
    for dy in (1, 2):
        y1 = y1 + jnp.dot(xpad_ref[dy:dy + H, :], w1_ref[dy],
                          preferred_element_type=f32)
    y1 = jnp.maximum(y1 + b1_ref[...], 0.0)          # (H, W*Cmid), bias broadcasts

    # ---- layer-1 -> layer-2 handoff stays in lane-dense VMEM (no HBM, no reshape) ----
    mpad_ref[0:1, :] = jnp.zeros((1, (W + 2) * Cmid), mpad_ref.dtype)
    mpad_ref[H + 1:H + 2, :] = jnp.zeros((1, (W + 2) * Cmid), mpad_ref.dtype)
    mpad_ref[:, 0:Cmid] = jnp.zeros((H + 2, Cmid), mpad_ref.dtype)
    mpad_ref[:, (W + 1) * Cmid:] = jnp.zeros((H + 2, Cmid), mpad_ref.dtype)
    mpad_ref[1:H + 1, Cmid:(W + 1) * Cmid] = y1.astype(mpad_ref.dtype)

    # ---- layer 2: same structure ----
    y2 = jnp.dot(mpad_ref[0:H, :], w2_ref[0], preferred_element_type=f32)
    for dy in (1, 2):
        y2 = y2 + jnp.dot(mpad_ref[dy:dy + H, :], w2_ref[dy],
                          preferred_element_type=f32)
    y2 = jnp.maximum(y2 + b2_ref[...], 0.0)          # (H, W*Cout)

    o_ref[0] = y2.astype(o_ref.dtype)                # lane-dense (H, W*Cout) store


def _band_weights(wf_hwio, W):
    """BN-folded HWIO weights (3,3,Ci,Co) -> 3 banded mats of ((W+2)*Ci, W*Co), bf16.

    band[dy][(w+dx)*Ci + ci, w*Co + co] = wf[dy, dx, ci, co], so that one matmul of a
    lane-dense padded row-slab (H, (W+2)*Ci) against band[dy] accumulates the whole
    dx/ci contraction directly into the (H, W*Co) lane-dense output layout.
    """
    _, _, Ci, Co = wf_hwio.shape
    bands = []
    for dy in range(3):
        m = jnp.zeros(((W + 2) * Ci, W * Co), jnp.float32)
        for dx in range(3):
            shift = jnp.eye(W + 2, W, k=-dx, dtype=jnp.float32)   # S[w+dx, w] = 1
            m = m + jnp.kron(shift, wf_hwio[dy, dx].astype(jnp.float32))
        bands.append(m)
    return jnp.stack(bands).astype(jnp.bfloat16)


def fused_double_conv(x_nhwc, w1_hwio, s1, b1, w2_hwio, s2, b2):
    """x_nhwc: (N,H,W,Cin); w*_hwio: (3,3,C,C'); s*/b*: per-channel (C',)."""
    N, H, W, Cin = x_nhwc.shape
    Cmid = w1_hwio.shape[-1]
    Cout = w2_hwio.shape[-1]

    # Fold BN scale into the weights (one-time wrapper math); only bias stays additive.
    w1b = _band_weights(w1_hwio * s1, W)              # (3, (W+2)*Cin,  W*Cmid) bf16
    w2b = _band_weights(w2_hwio * s2, W)              # (3, (W+2)*Cmid, W*Cout) bf16
    b1t = jnp.tile(b1, W).reshape(1, W * Cmid).astype(jnp.float32)
    b2t = jnp.tile(b2, W).reshape(1, W * Cout).astype(jnp.float32)

    # Lane-dense HBM input view: (N, H, W*Cin).
    x2d = x_nhwc.reshape(N, H, W * Cin)

    kernel = partial(_double_conv_kernel, H=H, W=W, Cin=Cin, Cmid=Cmid, Cout=Cout)

    y2d = pl.pallas_call(
        kernel,
        out_shape=jax.ShapeDtypeStruct((N, H, W * Cout), x_nhwc.dtype),
        grid_spec=pltpu.PrefetchScalarGridSpec(
            num_scalar_prefetch=0,
            grid=(N,),
            in_specs=[
                pl.BlockSpec((1, H, W * Cin), lambda n: (n, 0, 0)),
                pl.BlockSpec((3, (W + 2) * Cin, W * Cmid), lambda n: (0, 0, 0)),
                pl.BlockSpec((1, W * Cmid), lambda n: (0, 0)),
                pl.BlockSpec((3, (W + 2) * Cmid, W * Cout), lambda n: (0, 0, 0)),
                pl.BlockSpec((1, W * Cout), lambda n: (0, 0)),
            ],
            out_specs=pl.BlockSpec((1, H, W * Cout), lambda n: (n, 0, 0)),
            scratch_shapes=[
                pltpu.VMEM((H + 2, (W + 2) * Cin), jnp.bfloat16),    # padded input
                pltpu.VMEM((H + 2, (W + 2) * Cmid), jnp.bfloat16),   # padded layer-1 out
            ],
        ),
        compiler_params=pltpu.CompilerParams(
            dimension_semantics=("parallel",),
            vmem_limit_bytes=48 * 1024 * 1024),
    )(x2d, w1b, b1t, w2b, b2t)

    return y2d.reshape(N, H, W, Cout)


def _fold_bn(conv_bias, gamma, beta, running_mean, running_var, eps=1e-5):
    """Fold conv bias + eval-mode BatchNorm into per-channel scale/bias."""
    s = gamma / jnp.sqrt(running_var + eps)
    b = beta + (conv_bias - running_mean) * s
    return s, b


def double_conv_forward(x_nchw, params):
    """Forward of double_conv. Input/output in NCHW (PyTorch convention)."""
    # NOTE: the NCHW<->NHWC transposes are kept only to match the PyTorch interface.
    x = jnp.transpose(x_nchw, (0, 2, 3, 1))  # NCHW -> NHWC

    s1, b1 = _fold_bn(params["b1"], params["gamma1"], params["beta1"],
                      params["rm1"], params["rv1"])
    s2, b2 = _fold_bn(params["b2"], params["gamma2"], params["beta2"],
                      params["rm2"], params["rv2"])

    y = fused_double_conv(x, params["w1"], s1, b1, params["w2"], s2, b2)
    return jnp.transpose(y, (0, 3, 1, 2))    # NHWC -> NCHW


def _reference(x_nchw, params):
    """Pure-JAX reference (lax conv), for correctness checking only."""
    def block(x, w_hwio, cb, g, be, rm, rv):
        y = jax.lax.conv_general_dilated(
            x, w_hwio, window_strides=(1, 1), padding="SAME",
            dimension_numbers=("NCHW", "HWIO", "NCHW"))
        s, b = _fold_bn(cb, g, be, rm, rv)
        y = y * s[None, :, None, None] + b[None, :, None, None]
        return jnp.maximum(y, 0.0)

    y = block(x_nchw, params["w1"], params["b1"], params["gamma1"],
              params["beta1"], params["rm1"], params["rv1"])
    y = block(y, params["w2"], params["b2"], params["gamma2"],
              params["beta2"], params["rm2"], params["rv2"])
    return y


def make_params(key, in_ch, out_ch):
    ks = jax.random.split(key, 10)
    p = {}
    # Conv2d weights in PyTorch are (out, in, 3, 3); store as HWIO (3,3,in,out).
    p["w1"] = 0.1 * jax.random.normal(ks[0], (3, 3, in_ch, out_ch), jnp.float32)
    p["b1"] = 0.1 * jax.random.normal(ks[1], (out_ch,), jnp.float32)
    p["w2"] = 0.1 * jax.random.normal(ks[2], (3, 3, out_ch, out_ch), jnp.float32)
    p["b2"] = 0.1 * jax.random.normal(ks[3], (out_ch,), jnp.float32)
    # BatchNorm params / running stats (deterministic, non-trivial).
    p["gamma1"] = 1.0 + 0.1 * jax.random.normal(ks[4], (out_ch,), jnp.float32)
    p["beta1"] = 0.1 * jax.random.normal(ks[5], (out_ch,), jnp.float32)
    p["rm1"] = 0.05 * jax.random.normal(ks[6], (out_ch,), jnp.float32)
    p["rv1"] = 1.0 + 0.1 * jax.random.uniform(ks[7], (out_ch,), jnp.float32)
    p["gamma2"] = 1.0 + 0.1 * jax.random.normal(ks[8], (out_ch,), jnp.float32)
    p["beta2"] = 0.1 * jax.random.normal(ks[9], (out_ch,), jnp.float32)
    p["rm2"] = jnp.zeros((out_ch,), jnp.float32)
    p["rv2"] = jnp.ones((out_ch,), jnp.float32)
    return p


if __name__ == "__main__":
    key = jax.random.PRNGKey(0)
    k_x, k_p = jax.random.split(key)

    N, in_ch, out_ch, H, W = 2, 4, 8, 16, 16
    x = jax.random.normal(k_x, (N, in_ch, H, W), jnp.float32)   # NCHW input
    params = make_params(k_p, in_ch, out_ch)

    out = double_conv_forward(x, params)
    out = jax.block_until_ready(out)

    ref = jax.block_until_ready(_reference(x, params))
    assert out.shape == (N, out_ch, H, W)
    # Tolerance accounts for bf16 storage of weights/activations (with f32 MXU
    # accumulation) vs the f32 XLA conv reference; at default MXU precision the
    # previous f32-operand kernel incurred the same single-bf16-pass rounding.
    assert jnp.allclose(out, ref, atol=3e-2, rtol=3e-2), float(
        jnp.max(jnp.abs(out - ref)))

    print("KERNEL_OK")
</pallas_src>

<mosaic_0001>
module attributes {stable_mosaic.version = 11 : i64} {
  func.func @_double_conv_kernel(%arg0: i32, %arg1: memref<1x16x64xf32, #tpu.memory_space<vmem>>, %arg2: memref<3x72x128xbf16, #tpu.memory_space<vmem>>, %arg3: memref<1x128xf32, #tpu.memory_space<vmem>>, %arg4: memref<3x144x128xbf16, #tpu.memory_space<vmem>>, %arg5: memref<1x128xf32, #tpu.memory_space<vmem>>, %arg6: memref<1x16x128xf32, #tpu.memory_space<vmem>>, %arg7: memref<18x72xbf16, #tpu.memory_space<vmem>>, %arg8: memref<18x144xbf16, #tpu.memory_space<vmem>>) attributes {dimension_semantics = [#tpu.dimension_semantics<parallel>], iteration_bounds = array<i64: 2>, scalar_prefetch = 0 : i64, scratch_operands = 2 : i64, tpu.core_type = #tpu.core_type<tc>, window_params = [{transform_indices = @transform_0, window_bounds = array<i64: 1, 16, 64>}, {pipeline_mode = #tpu.pipeline_mode<synchronous>, transform_indices = @transform_1, window_bounds = array<i64: 3, 72, 128>}, {pipeline_mode = #tpu.pipeline_mode<synchronous>, transform_indices = @transform_2, window_bounds = array<i64: 1, 128>}, {pipeline_mode = #tpu.pipeline_mode<synchronous>, transform_indices = @transform_3, window_bounds = array<i64: 3, 144, 128>}, {pipeline_mode = #tpu.pipeline_mode<synchronous>, transform_indices = @transform_4, window_bounds = array<i64: 1, 128>}, {transform_indices = @transform_5, window_bounds = array<i64: 1, 16, 128>}]} {
    %cst = arith.constant 0.000000e+00 : bf16
    %0 = vector.broadcast %cst : bf16 to vector<1x72xbf16>
    %c0 = arith.constant 0 : index
    %c0_0 = arith.constant 0 : index
    %1 = vector.load %arg7[%c0, %c0_0] : memref<18x72xbf16, #tpu.memory_space<vmem>>, vector<1x72xbf16>
    tpu.vector_store %arg7[%c0, %c0_0], %0 {strides = array<i32>} : memref<18x72xbf16, #tpu.memory_space<vmem>>, vector<1x72xbf16>,
    %cst_1 = arith.constant 0.000000e+00 : bf16
    %2 = vector.broadcast %cst_1 : bf16 to vector<1x72xbf16>
    %c17 = arith.constant 17 : index
    %c0_2 = arith.constant 0 : index
    %3 = vector.load %arg7[%c17, %c0_2] : memref<18x72xbf16, #tpu.memory_space<vmem>>, vector<1x72xbf16>
    tpu.vector_store %arg7[%c17, %c0_2], %2 {strides = array<i32>} : memref<18x72xbf16, #tpu.memory_space<vmem>>, vector<1x72xbf16>,
    %cst_3 = arith.constant 0.000000e+00 : bf16
    %4 = vector.broadcast %cst_3 : bf16 to vector<18x4xbf16>
    %c0_4 = arith.constant 0 : index
    %c0_5 = arith.constant 0 : index
    %5 = vector.load %arg7[%c0_4, %c0_5] : memref<18x72xbf16, #tpu.memory_space<vmem>>, vector<18x4xbf16>
    tpu.vector_store %arg7[%c0_4, %c0_5], %4 {strides = array<i32>} : memref<18x72xbf16, #tpu.memory_space<vmem>>, vector<18x4xbf16>,
    %cst_6 = arith.constant 0.000000e+00 : bf16
    %6 = vector.broadcast %cst_6 : bf16 to vector<18x4xbf16>
    %c0_7 = arith.constant 0 : index
    %c68 = arith.constant 68 : index
    %7 = vector.load %arg7[%c0_7, %c68] : memref<18x72xbf16, #tpu.memory_space<vmem>>, vector<18x4xbf16>
    tpu.vector_store %arg7[%c0_7, %c68], %6 {strides = array<i32>} : memref<18x72xbf16, #tpu.memory_space<vmem>>, vector<18x4xbf16>,
    %c0_8 = arith.constant 0 : index
    %c0_9 = arith.constant 0 : index
    %c0_10 = arith.constant 0 : index
    %8 = vector.load %arg1[%c0_8, %c0_9, %c0_10] : memref<1x16x64xf32, #tpu.memory_space<vmem>>, vector<1x16x64xf32>
    %9 = vector.shape_cast %8 : vector<1x16x64xf32> to vector<16x64xf32>
    %10 = arith.truncf %9 : vector<16x64xf32> to vector<16x64xbf16>
    %c1 = arith.constant 1 : index
    %c4 = arith.constant 4 : index
    %11 = vector.load %arg7[%c1, %c4] : memref<18x72xbf16, #tpu.memory_space<vmem>>, vector<16x64xbf16>
    tpu.vector_store %arg7[%c1, %c4], %10 {strides = array<i32>} : memref<18x72xbf16, #tpu.memory_space<vmem>>, vector<16x64xbf16>,
    %c0_11 = arith.constant 0 : index
    %c0_12 = arith.constant 0 : index
    %12 = vector.load %arg7[%c0_11, %c0_12] : memref<18x72xbf16, #tpu.memory_space<vmem>>, vector<16x72xbf16>
    %c0_13 = arith.constant 0 : index
    %c0_14 = arith.constant 0 : index
    %c0_15 = arith.constant 0 : index
    %13 = vector.load %arg2[%c0_13, %c0_14, %c0_15] : memref<3x72x128xbf16, #tpu.memory_space<vmem>>, vector<1x72x128xbf16>
    %14 = vector.shape_cast %13 : vector<1x72x128xbf16> to vector<72x128xbf16>
    %cst_16 = arith.constant dense<0.000000e+00> : vector<16x128xf32>
    %15 = tpu.matmul %12, %14, %cst_16 {dimension_numbers = #tpu.dot_dimension_numbers<[1], [0], [0], [1], [0, 0, 1, 1], [], []>} : vector<16x72xbf16>, vector<72x128xbf16>, vector<16x128xf32> -> vector<16x128xf32>
    %c1_17 = arith.constant 1 : index
    %c0_18 = arith.constant 0 : index
    %16 = vector.load %arg7[%c1_17, %c0_18] : memref<18x72xbf16, #tpu.memory_space<vmem>>, vector<16x72xbf16>
    %c1_19 = arith.constant 1 : index
    %c0_20 = arith.constant 0 : index
    %c0_21 = arith.constant 0 : index
    %17 = vector.load %arg2[%c1_19, %c0_20, %c0_21] : memref<3x72x128xbf16, #tpu.memory_space<vmem>>, vector<1x72x128xbf16>
    %18 = vector.shape_cast %17 : vector<1x72x128xbf16> to vector<72x128xbf16>
    %cst_22 = arith.constant dense<0.000000e+00> : vector<16x128xf32>
    %19 = tpu.matmul %16, %18, %cst_22 {dimension_numbers = #tpu.dot_dimension_numbers<[1], [0], [0], [1], [0, 0, 1, 1], [], []>} : vector<16x72xbf16>, vector<72x128xbf16>, vector<16x128xf32> -> vector<16x128xf32>
    %20 = arith.addf %15, %19 : vector<16x128xf32>
    %c2 = arith.constant 2 : index
    %c0_23 = arith.constant 0 : index
    %21 = vector.load %arg7[%c2, %c0_23] : memref<18x72xbf16, #tpu.memory_space<vmem>>, vector<16x72xbf16>
    %c2_24 = arith.constant 2 : index
    %c0_25 = arith.constant 0 : index
    %c0_26 = arith.constant 0 : index
    %22 = vector.load %arg2[%c2_24, %c0_25, %c0_26] : memref<3x72x128xbf16, #tpu.memory_space<vmem>>, vector<1x72x128xbf16>
    %23 = vector.shape_cast %22 : vector<1x72x128xbf16> to vector<72x128xbf16>
    %cst_27 = arith.constant dense<0.000000e+00> : vector<16x128xf32>
    %24 = tpu.matmul %21, %23, %cst_27 {dimension_numbers = #tpu.dot_dimension_numbers<[1], [0], [0], [1], [0, 0, 1, 1], [], []>} : vector<16x72xbf16>, vector<72x128xbf16>, vector<16x128xf32> -> vector<16x128xf32>
    %25 = arith.addf %20, %24 : vector<16x128xf32>
    %c0_28 = arith.constant 0 : index
    %c0_29 = arith.constant 0 : index
    %26 = vector.load %arg3[%c0_28, %c0_29] : memref<1x128xf32, #tpu.memory_space<vmem>>, vector<1x128xf32>
    %27 = vector.broadcast %26 : vector<1x128xf32> to vector<16x128xf32>
    %28 = arith.addf %25, %27 : vector<16x128xf32>
    %cst_30 = arith.constant 0.000000e+00 : f32
    %29 = vector.broadcast %cst_30 : f32 to vector<16x128xf32>
    %30 = arith.maximumf %28, %29 : vector<16x128xf32>
    %cst_31 = arith.constant 0.000000e+00 : bf16
    %31 = vector.broadcast %cst_31 : bf16 to vector<1x144xbf16>
    %c0_32 = arith.constant 0 : index
    %c0_33 = arith.constant 0 : index
    %32 = vector.load %arg8[%c0_32, %c0_33] : memref<18x144xbf16, #tpu.memory_space<vmem>>, vector<1x144xbf16>
    tpu.vector_store %arg8[%c0_32, %c0_33], %31 {strides = array<i32>} : memref<18x144xbf16, #tpu.memory_space<vmem>>, vector<1x144xbf16>,
    %cst_34 = arith.constant 0.000000e+00 : bf16
    %33 = vector.broadcast %cst_34 : bf16 to vector<1x144xbf16>
    %c17_35 = arith.constant 17 : index
    %c0_36 = arith.constant 0 : index
    %34 = vector.load %arg8[%c17_35, %c0_36] : memref<18x144xbf16, #tpu.memory_space<vmem>>, vector<1x144xbf16>
    tpu.vector_store %arg8[%c17_35, %c0_36], %33 {strides = array<i32>} : memref<18x144xbf16, #tpu.memory_space<vmem>>, vector<1x144xbf16>,
    %cst_37 = arith.constant 0.000000e+00 : bf16
    %35 = vector.broadcast %cst_37 : bf16 to vector<18x8xbf16>
    %c0_38 = arith.constant 0 : index
    %c0_39 = arith.constant 0 : index
    %36 = vector.load %arg8[%c0_38, %c0_39] : memref<18x144xbf16, #tpu.memory_space<vmem>>, vector<18x8xbf16>
    tpu.vector_store %arg8[%c0_38, %c0_39], %35 {strides = array<i32>} : memref<18x144xbf16, #tpu.memory_space<vmem>>, vector<18x8xbf16>,
    %cst_40 = arith.constant 0.000000e+00 : bf16
    %37 = vector.broadcast %cst_40 : bf16 to vector<18x8xbf16>
    %c0_41 = arith.constant 0 : index
    %c136 = arith.constant 136 : index
    %38 = vector.load %arg8[%c0_41, %c136] : memref<18x144xbf16, #tpu.memory_space<vmem>>, vector<18x8xbf16>
    tpu.vector_store %arg8[%c0_41, %c136], %37 {strides = array<i32>} : memref<18x144xbf16, #tpu.memory_space<vmem>>, vector<18x8xbf16>,
    %39 = arith.truncf %30 : vector<16x128xf32> to vector<16x128xbf16>
    %c1_42 = arith.constant 1 : index
    %c8 = arith.constant 8 : index
    %40 = vector.load %arg8[%c1_42, %c8] : memref<18x144xbf16, #tpu.memory_space<vmem>>, vector<16x128xbf16>
    tpu.vector_store %arg8[%c1_42, %c8], %39 {strides = array<i32>} : memref<18x144xbf16, #tpu.memory_space<vmem>>, vector<16x128xbf16>,
    %c0_43 = arith.constant 0 : index
    %c0_44 = arith.constant 0 : index
    %41 = vector.load %arg8[%c0_43, %c0_44] : memref<18x144xbf16, #tpu.memory_space<vmem>>, vector<16x144xbf16>
    %c0_45 = arith.constant 0 : index
    %c0_46 = arith.constant 0 : index
    %c0_47 = arith.constant 0 : index
    %42 = vector.load %arg4[%c0_45, %c0_46, %c0_47] : memref<3x144x128xbf16, #tpu.memory_space<vmem>>, vector<1x144x128xbf16>
    %43 = vector.shape_cast %42 : vector<1x144x128xbf16> to vector<144x128xbf16>
    %cst_48 = arith.constant dense<0.000000e+00> : vector<16x128xf32>
    %44 = tpu.matmul %41, %43, %cst_48 {dimension_numbers = #tpu.dot_dimension_numbers<[1], [0], [0], [1], [0, 0, 1, 1], [], []>} : vector<16x144xbf16>, vector<144x128xbf16>, vector<16x128xf32> -> vector<16x128xf32>
    %c1_49 = arith.constant 1 : index
    %c0_50 = arith.constant 0 : index
    %45 = vector.load %arg8[%c1_49, %c0_50] : memref<18x144xbf16, #tpu.memory_space<vmem>>, vector<16x144xbf16>
    %c1_51 = arith.constant 1 : index
    %c0_52 = arith.constant 0 : index
    %c0_53 = arith.constant 0 : index
    %46 = vector.load %arg4[%c1_51, %c0_52, %c0_53] : memref<3x144x128xbf16, #tpu.memory_space<vmem>>, vector<1x144x128xbf16>
    %47 = vector.shape_cast %46 : vector<1x144x128xbf16> to vector<144x128xbf16>
    %cst_54 = arith.constant dense<0.000000e+00> : vector<16x128xf32>
    %48 = tpu.matmul %45, %47, %cst_54 {dimension_numbers = #tpu.dot_dimension_numbers<[1], [0], [0], [1], [0, 0, 1, 1], [], []>} : vector<16x144xbf16>, vector<144x128xbf16>, vector<16x128xf32> -> vector<16x128xf32>
    %49 = arith.addf %44, %48 : vector<16x128xf32>
    %c2_55 = arith.constant 2 : index
    %c0_56 = arith.constant 0 : index
    %50 = vector.load %arg8[%c2_55, %c0_56] : memref<18x144xbf16, #tpu.memory_space<vmem>>, vector<16x144xbf16>
    %c2_57 = arith.constant 2 : index
    %c0_58 = arith.constant 0 : index
    %c0_59 = arith.constant 0 : index
    %51 = vector.load %arg4[%c2_57, %c0_58, %c0_59] : memref<3x144x128xbf16, #tpu.memory_space<vmem>>, vector<1x144x128xbf16>
    %52 = vector.shape_cast %51 : vector<1x144x128xbf16> to vector<144x128xbf16>
    %cst_60 = arith.constant dense<0.000000e+00> : vector<16x128xf32>
    %53 = tpu.matmul %50, %52, %cst_60 {dimension_numbers = #tpu.dot_dimension_numbers<[1], [0], [0], [1], [0, 0, 1, 1], [], []>} : vector<16x144xbf16>, vector<144x128xbf16>, vector<16x128xf32> -> vector<16x128xf32>
    %54 = arith.addf %49, %53 : vector<16x128xf32>
    %c0_61 = arith.constant 0 : index
    %c0_62 = arith.constant 0 : index
    %55 = vector.load %arg5[%c0_61, %c0_62] : memref<1x128xf32, #tpu.memory_space<vmem>>, vector<1x128xf32>
    %56 = vector.broadcast %55 : vector<1x128xf32> to vector<16x128xf32>
    %57 = arith.addf %54, %56 : vector<16x128xf32>
    %cst_63 = arith.constant 0.000000e+00 : f32
    %58 = vector.broadcast %cst_63 : f32 to vector<16x128xf32>
    %59 = arith.maximumf %57, %58 : vector<16x128xf32>
    %c0_64 = arith.constant 0 : index
    %c0_65 = arith.constant 0 : index
    %c0_66 = arith.constant 0 : index
    %60 = vector.load %arg6[%c0_64, %c0_65, %c0_66] : memref<1x16x128xf32, #tpu.memory_space<vmem>>, vector<1x16x128xf32>
    %61 = vector.shape_cast %60 : vector<1x16x128xf32> to vector<16x128xf32>
    %62 = vector.shape_cast %59 : vector<16x128xf32> to vector<1x16x128xf32>
    tpu.vector_store %arg6[%c0_64, %c0_65, %c0_66], %62 {strides = array<i32>} : memref<1x16x128xf32, #tpu.memory_space<vmem>>, vector<1x16x128xf32>,
    return
  }
  func.func @transform_0(%arg0: i32) -> (i32, i32, i32) {
    %c0_i32 = arith.constant 0 : i32
    %c0_i32_0 = arith.constant 0 : i32
    %c0_i32_1 = arith.constant 0 : i32
    return %arg0, %c0_i32, %c0_i32_0 : i32, i32, i32
  }
  func.func @transform_1(%arg0: i32) -> (i32, i32, i32) {
    %c0_i32 = arith.constant 0 : i32
    %c0_i32_0 = arith.constant 0 : i32
    %c0_i32_1 = arith.constant 0 : i32
    %c0_i32_2 = arith.constant 0 : i32
    return %c0_i32, %c0_i32_0, %c0_i32_1 : i32, i32, i32
  }
  func.func @transform_2(%arg0: i32) -> (i32, i32) {
    %c0_i32 = arith.constant 0 : i32
    %c0_i32_0 = arith.constant 0 : i32
    %c0_i32_1 = arith.constant 0 : i32
    return %c0_i32, %c0_i32_0 : i32, i32
  }
  func.func @transform_3(%arg0: i32) -> (i32, i32, i32) {
    %c0_i32 = arith.constant 0 : i32
    %c0_i32_0 = arith.constant 0 : i32
    %c0_i32_1 = arith.constant 0 : i32
    %c0_i32_2 = arith.constant 0 : i32
    return %c0_i32, %c0_i32_0, %c0_i32_1 : i32, i32, i32
  }
  func.func @transform_4(%arg0: i32) -> (i32, i32) {
    %c0_i32 = arith.constant 0 : i32
    %c0_i32_0 = arith.constant 0 : i32
    %c0_i32_1 = arith.constant 0 : i32
    return %c0_i32, %c0_i32_0 : i32, i32
  }
  func.func @transform_5(%arg0: i32) -> (i32, i32, i32) {
    %c0_i32 = arith.constant 0 : i32
    %c0_i32_0 = arith.constant 0 : i32
    %c0_i32_1 = arith.constant 0 : i32
    return %arg0, %c0_i32, %c0_i32_0 : i32, i32, i32
  }
}

</mosaic_0001>

<bundles_post_ra>
// kernel: tpu_custom_call.1
= control target key start
LH: loop header
LB: loop body
LE: loop exit
PB: predicated region body
PF: predicated region fallthrough
CT: control target
= control target key end

     0   :  { %10 = vsyncpa [#allocation5], 0  ;;  %s1849_s0 = inlined_call_operand.hbm [shape: f32[2,16,64], index: 0, kind: input, shape index: {}]   ;;  %s1850_s1 = inlined_call_operand.hbm [shape: bf16[3,72,128], index: 1, kind: input, shape index: {}]   ;;  %s1851_s2 = inlined_call_operand.vmem [shape: f32[1,128], index: 2, kind: input, shape index: {}]   ;;  %s1852_s3 = inlined_call_operand.hbm [shape: bf16[3,144,128], index: 3, kind: input, shape index: {}]   ;;  %s1853_s4 = inlined_call_operand.vmem [shape: f32[1,128], index: 4, kind: input, shape index: {}]   ;;  %s1854_s5 = inlined_call_operand.hbm [shape: f32[2,16,128], index: 5, kind: output, shape index: {}]  }
   0x1   :  { %12 = vsyncpa [#allocation5 + $0x1], 0 }
   0x2   :  { %13 = vsyncpa [#allocation8], 0 }
   0x3   :  { %14 = vsyncpa [#allocation6], 0 }
   0x4   :  { %16 = vsyncpa [#allocation6 + $0x1], 0  ;;  %s1631_s18 = smov 0   ;;  %s1633_s19 = smov 0  }
   0x5   :  { %s1635_s20 = smov 0   ;;  %s1637_s21 = smov 0  }
   0x6 LB: > { %s1652_s22 = sadd.s32 4294967295, %s1589_s21   ;;  %s1124_s23 = sadd.s32 4294967294, %s1589_s21   ;;  %s1589_s21 = sphi %s1637_s21, %s1872_s21   ;;  %s1585_s20 = sphi %s1635_s20, %s1871_s20   ;;  %s1581_s19 = sphi %s1633_s19, %s1870_s19   ;;  %s1577_s18 = sphi %s1631_s18, %s1869_s18  }
   0x7   : > { %p42_p0 = scmp.ne.s32.totalorder %s1581_s19, %s1577_s18  ;;  %p43_p1 = scmp.eq.s32.totalorder %s1652_s22, 0 }
   0x8   : > { %p150_p2 = scmp.eq.s32.totalorder %s1652_s22, 1  ;;  %p156_p3 = scmp.eq.s32.totalorder %s1124_s23, 1 }
   0x9   : > { %p1661_p4 = por %p43_p1, %p42_p0  ;;  %p1125_p5 = scmp.ge.s32.totalorder %s1589_s21, 1 }
   0xa   : > { %p1666_p6 = por %p156_p3, %p42_p0  ;;  %p163_p7 = scmp.lt.s32.totalorder %s1589_s21, 3 }
   0xb   : > { %s174_s28 = sshll.u32 %s1850_s1, 4  ;;  %s1591_s30 = smov [#allocation7]   ;;  %s175_s28 = int_to_ptr.hbm [resolvable:$true] %s174_s28 }
   0xc   : > { %p1674_p8 = pnand %p1125_p5, %p163_p7  ;;  %s176_s6 = sshll.u32 %s1591_s30, 4  ;;  %s177_s6 = int_to_ptr.vmem [resolvable:$true] %s176_s6 }
   0xd   : > { %s191_s9 = sshll.u32 %s1852_s3, 4  ;;  %s1592_s10 = smov 64   ;;  %s192_s9 = int_to_ptr.hbm [resolvable:$true] %s191_s9 }
   0xe   : > { %p1364_p9 = pneg %p1674_p8  ;;  %s1593_s11 = smov 4  }
   0xf   : > { %s1594_s12 = smov [#allocation9]   ;;  %s1687_s14 = sadd.s32 1, %s1589_s21  }
  0x10   : > { %p1365_p10 = pnand %p1364_p9, %p43_p1  ;;  %s193_s13 = sshll.u32 %s1594_s12, 4  ;;  %s194_s13 = int_to_ptr.vmem [resolvable:$true] %s193_s13 }
  0x11   : > { %s29_s15 = sadd.s32 1, %s1585_s20  ;;  %s26_s16 = ssub.s32 %s1589_s21, %s1687_s14 }
  0x12   : > { %1367 = dma.hbm_to_vmem [thread:$0]  (!%p1365_p10), %s175_s28, 1728, %s177_s6, [#allocation8], %s1592_s10, %s1592_s10, %s1593_s11  }
  0x13   : > { %1370 = dma.hbm_to_vmem [thread:$0]  (!%p1365_p10), %s192_s9, 3456, %s194_s13, [#allocation8], %s1592_s10, %s1592_s10, %s1593_s11  }
  0x14   : > { %p36_p12 = scmp.ne.s32.totalorder %s1585_s20, %s1581_s19  ;;  %p27_p13 = scmp.eq.s32.totalorder %s26_s16, 0 }
  0x15   : > { %p37_p0 = scmp.eq.s32.totalorder %s1589_s21, 0  ;;  %p1381_p5 = scmp.lt.s32.totalorder %s1589_s21, 2 }
  0x16   : > { %p1697_p3 = por %p150_p2, %p36_p12  ;;  %s210_s26 = sand.u32 1, %s1585_s20  }
  0x17   : > { %s1703_s23 = scalar_select %p27_p13, %s1585_s20, %s29_s15  }
  0x18   : > { %p38_p7 = por %p37_p0, %p36_p12  ;;  %s1129_s27 = sshll.u32 %s210_s26, 4 }
  0x19   : > { %s1304_s28 = sshll.u32 %s1589_s21, 4  ;;  %s214_s8 = scalar_lea.vmem [#allocation4], %s1129_s27 }
  0x1a   : > { %s219_s7 = scalar_lea.hbm %s1849_s0, %s1304_s28  ;;  %s222_s9 = sshll.u32 %s214_s8, 4  ;;  %s223_s9 = int_to_ptr.vmem [resolvable:$true] %s222_s9 }
  0x1b   : > { %s220_s10 = sshll.u32 %s219_s7, 4  ;;  %p1710_p2 = pnand %p1381_p5, %p38_p7  ;;  %s221_s10 = int_to_ptr.hbm [resolvable:$true] %s220_s10 }
  0x1c   : > { %s211_s12 = scalar_lea.sflag [#allocation5], %s210_s26  ;;  %s1489_s13 = sshra.s32 %s221_s10, 4  ;;  %s1490_s13 = int_to_ptr.hbm [resolvable:$true] %s1489_s13 }
  0x1d   : > { %s1491_s15 = scalar_lea.hbm %s1490_s13, 16  ;;  %p1493_p10 = pneg %p1710_p2 }
  0x1e   : > { %p1492_p9 = scmp.ne.s32.totalorder %s1490_s13, %s1491_s15  ;;  %s1496_s28 = scalar_lea.hbm %s1849_s0, 32 }
  0x1f   : > { %p1497_p0 = scmp.lt.s32.totalorder %s1490_s13, %s1849_s0  ;;  %p1498_p5 = scmp.lt.s32.totalorder %s1496_s28, %s1491_s15 }
  0x20   : > { %p1494_p12 = pnand %p1493_p10, %p1492_p9 }
  0x21   : > { %p1499_p7 = por %p1498_p5, %p1497_p0 }
  0x22   : > { %p1495_p13 = pneg %p1494_p12 }
  0x24   : > { %p1500_p11 = pnand %p1499_p7, %p1495_p13 }
  0x26   : > { %1503 = shalt.err (!%p1500_p11)
}
  0x27   : > { %s1595_s26 = smov 128   ;;  %s1596_s7 = smov 8  }
  0x28   : > { %1374 = dma.hbm_to_vmem [thread:$0]  (!%p1710_p2), %s221_s10, 256, %s223_s9, %s211_s12, %s1595_s26, %s1595_s26, %s1596_s7  }
  0x29   : > { %234 = sbr.rel (%p1674_p8) target bundleno = 640 (0x280), region = 40  ;;  %s1727_s8 = sand.u32 (!%p1674_p8), 1, %s1581_s19  }
  0x2a   : > { %s1133_s13 = sshll.u32 (!%p1674_p8), %s1727_s8, 4  ;;  %s237_s15 = scalar_lea.sflag (!%p1674_p8), [#allocation5], %s1727_s8 }
  0x2b   : > { %s240_s16 = scalar_lea.vmem (!%p1674_p8), [#allocation4], %s1133_s13 }
  0x2e   : > { %1564 = dma.done.wait (%p1661_p4), %s237_s15, 256  }
  0x2f   : > { %1566 = vsyncadd (%p1661_p4), %s237_s15, 4294967040 }
  0x30   : > { %1568 = dma.done.wait (%p43_p1), [#allocation8], 5184  }
  0x31   : > { %1570 = vsyncadd (%p43_p1), [#allocation8], 4294962112  ;;  %v301_v0 = vld [vmem:[%s240_s16 + $0x8] sm:$0xff]  ;;  %v300_v1 = vld [vmem:[%s240_s16] sm:$0xff]  ;;  %vm280_vm0 = vsmask.f32 256 }
  0x32   : > { %v354_v2 = vld [vmem:[#allocation7 + $0x20] sm:$0xf]  ;;  %v303_v3 = vpack.c.bf16 %v301_v0, %v301_v0  ;;  %v302_v4 = vpack.c.bf16 %v300_v1, %v300_v1  ;;  %vm304_vm1 = vsmask.f32 4368  ;;  %vm418_vm2 = vcmask 1043456   ;;  %s1597_s24 = smov 4  }
  0x33   : > { %v453_v5 = vunpack.c.l.b16 %v354_v2  ;;  %vm1742_vm3 = vmor %vm280_vm0, %vm304_vm1  ;;  %vm279_vm4 = vcmask 581632   ;;  %vm285_vm5 = vsmask.f32 7938  ;;  %vm293_vm7 = vcmask 24576   ;;  %v287_v20 = vld [vmem:[#allocation2 + $0x8] sm:$0x1] }
  0x34   : > { %v315_v6 = vshrl.u32 %v303_v3, 16  ;;  %v307_v7 = vshrl.u32 %v302_v4, 16  ;;  %v318_v8 = vshll.u32 %v303_v3, 16  ;;  %v310_v17 = vshll.u32 %v302_v4, 16  ;;  %vm286_vm6 = vmand %vm279_vm4, %vm285_vm5  ;;  %v282_v23 = vld [vmem:[#allocation2] sm:$0x1] }
  0x35   : > { %v458_v9 = vpack.c.b16 %v453_v5, %v453_v5  ;;  %vm298_vm8 = vcmask 582176   ;;  %v288_v21 = vsel %vm286_vm6, 0, %v287_v20  ;;  %v1598_v22 = vmov 0   ;;  %vm281_vm9 = vmand %vm279_vm4, %vm280_vm0  ;;  %v492_v24 = vld [vmem:[#allocation7 + $0x68] sm:$0xf]  ;;  %v1308_v28 = vld [vmem:[#allocation7 + $0x18] sm:$0xff] }
  0x36   : > { %v317_v10 = vrot.slane %v315_v6, 7  ;;  %v309_v11 = vrot.slane %v307_v7, 7  ;;  %289 = vst [vmem:[#allocation2 + $0x8] sm:$0x1] %v288_v21  ;;  %v283_v25 = vsel %vm281_vm9, 0, %v282_v23  ;;  %v517_v26 = vunpack.c.l.b16 %v492_v24  ;;  %v1307_v33 = vld [vmem:[#allocation7 + $0x10] sm:$0xff] }
  0x37   : > { %v466_v13 = vsel %vm418_vm2, %v458_v9, 0  ;;  %294 = vst.msk [vmem:[#allocation2 + $0x8] sm:$0x1] %vm293_vm7, %v1598_v22  ;;  %vm290_vm10 = vcmask 27648   ;;  %v365_v27 = vld [vmem:[#allocation7 + $0x44] sm:$0xf] }
  0x38   : > { %v322_v14 = vrot.slane %v317_v10, 4  ;;  %v313_v15 = vrot.slane %v309_v11, 4  ;;  %v320_v16 = vor.u32 %v318_v8, %v317_v10  ;;  %471 = vmatpush.bf16.msra.mxu1 %v466_v13  ;;  %v312_v19 = vor.u32 %v310_v17, %v309_v11  ;;  %299 = vst.msk [vmem:[#allocation2 + $0x8] sm:$0x1] %vm298_vm8, %v1598_v22  ;;  %v1316_v34 = vld [vmem:[#allocation7 + $0x60] sm:$0xff]  ;;  %v1306_v37 = vld [vmem:[#allocation7 + $0x8] sm:$0xff] }
  0x39   : > { %284 = vst [vmem:[#allocation2] sm:$0x1] %v283_v25  ;;  %vm295_vm11 = vcmask 585248   ;;  %v522_v29 = vpack.c.b16 %v517_v26, %v517_v26  ;;  %v404_v30 = vunpack.c.l.b16 %v365_v27  ;;  %v1312_v36 = vld [vmem:[#allocation7 + $0x3c] sm:$0xff]  ;;  %v1311_v39 = vld [vmem:[#allocation7 + $0x34] sm:$0xff]  ;;  %v1310_v42 = vld [vmem:[#allocation7 + $0x2c] sm:$0xff] }
  0x3a   : > { %327 = vrot.lane.b32.xlu0 %v322_v14, %s1597_s24  ;;  %v321_v18 = vsel %vm1742_vm3, %v313_v15, %v320_v16  ;;  %291 = vst.msk [vmem:[#allocation2] sm:$0xf] %vm290_vm10, %v1598_v22  ;;  %v1315_v38 = vld [vmem:[#allocation7 + $0x58] sm:$0xff]  ;;  %v1305_v40 = vld [vmem:[#allocation7] sm:$0xff]  ;;  %v1314_v41 = vld [vmem:[#allocation7 + $0x50] sm:$0xff]  ;;  %vm339_vm12 = vcmask 548896  }
  0x3b   : > { %325 = vrot.lane.b32.xlu1 %v321_v18, %s1597_s24  ;;  %296 = vst.msk [vmem:[#allocation2] sm:$0xf] %vm295_vm11, %v1598_v22  ;;  %v531_v31 = vsel %vm418_vm2, %v522_v29, 0  ;;  %v409_v32 = vpack.c.b16 %v404_v30, %v404_v30  ;;  %v1313_v43 = vld [vmem:[#allocation7 + $0x48] sm:$0xff]  ;;  %vm340_vm13 = vmand %vm339_vm12, %vm280_vm0  ;;  %vm332_vm14 = vcmask 551968   ;;  %vm414_vm1 = vcmask 588800  }
  0x3c   : > { %472 = vmatpush.bf16.msra.mxu1 %v1308_v28  ;;  %292 = vst.msk [vmem:[#allocation2 + $0x4] sm:$0xf] %vm290_vm10, %v1598_v22  ;;  %536 = vmatpush.bf16.msra.mxu2 %v531_v31  ;;  %v1309_v44 = vld [vmem:[#allocation7 + $0x24] sm:$0xff]  ;;  %vm333_vm15 = vmand %vm332_vm14, %vm285_vm5  ;;  %vm1856_vm4 = vsmask.f32 7424  ;;  %v1333_v10 = vld [vmem:[#allocation9 + $0x80] sm:$0xff] }
  0x3d   : > { %297 = vst.msk [vmem:[#allocation2 + $0x4] sm:$0xf] %vm295_vm11, %v1598_v22  ;;  %v420_v35 = vsel %vm418_vm2, %v409_v32, 0  ;;  %vm1855_vm2 = vcmask 1046528   ;;  %v1427_v8 = vld [vmem:[%s1851_s2] ss:$0 sm:$0xff]  ;;  %774 = vmatpush.bf16.msra.mxu3 %v1333_v10 }
  0x3e   : > { %425 = vmatpush.bf16.msra.mxu0 %v420_v35  ;;  %vm573_vm6 = vcmask 60416   ;;  %vm578_vm7 = vcmask 126016   ;;  %v1332_v13 = vld [vmem:[#allocation9 + $0x78] sm:$0xff]  ;;  %s1599_s10 = smov 8   ;;  %vm557_vm8 = vcmask 1040384   ;;  %vm559_vm9 = vcmask 126980  }
  0x3f   : > { %v341_v45 = vld [vmem:[#allocation2 + $0x8] sm:$0x1]  ;;  %575 = vst.msk [vmem:[#allocation3 + $0x8] sm:$0xf] %vm573_vm6, %v1598_v22  ;;  %vm567_vm10 = vsmask.f32 7954 }
  0x40   : > { %473 = vmatpush.bf16.msra.mxu1 %v1307_v33  ;;  %537 = vmatpush.bf16.msra.mxu2 %v1316_v34  ;;  %580 = vst.msk [vmem:[#allocation3 + $0xc] sm:$0xf] %vm578_vm7, %v1598_v22  ;;  %vm568_vm11 = vmand %vm559_vm9, %vm567_vm10  ;;  %v570_v12 = vld [vmem:[#allocation3 + $0x10] sm:$0x11]  ;;  %s1344_s27 = sshll.u32 %s1652_s22, 4  ;;  %s277_s28 = scalar_lea.vmem [#allocation10], %s1133_s13 }
  0x41   : > { %775 = vmatpush.bf16.msra.mxu3 %v1332_v13  ;;  %s1028_s26 = scalar_lea.hbm %s1854_s5, %s1344_s27  ;;  %s1029_s7 = sshll.u32 %s277_s28, 4  ;;  %s1030_s7 = int_to_ptr.vmem [resolvable:$true] %s1029_s7 }
  0x42   : > { %323 = vrot.lane.b32.xlu0 %v312_v19, %s1597_s24  ;;  %426 = vmatpush.bf16.msra.mxu0 %v1312_v36  ;;  %v334_v49 = vld [vmem:[#allocation2] sm:$0xf]  ;;  %s1031_s15 = sshll.u32 %s1028_s26, 4  ;;  %s1017_s22 = scalar_lea.sflag [#allocation6], %s1727_s8  ;;  %s1032_s15 = int_to_ptr.hbm [resolvable:$true] %s1031_s15 }
  0x43   : > { %s1533_s16 = sshra.s32 %s1032_s15, 4  ;;  %s1539_s9 = scalar_lea.hbm %s1854_s5, 32  ;;  %s1534_s16 = int_to_ptr.hbm [resolvable:$true] %s1533_s16 }
  0x44   : > { %474 = vmatpush.bf16.msra.mxu1 %v1306_v37  ;;  %538 = vmatpush.bf16.msra.mxu2 %v1315_v38  ;;  %v1324_v37 = vld [vmem:[#allocation9 + $0x38] sm:$0xff]  ;;  %v1331_v38 = vld [vmem:[#allocation9 + $0x70] sm:$0xff]  ;;  %s1535_s13 = scalar_lea.hbm %s1534_s16, 16  ;;  %p1540_p11 = scmp.lt.s32.totalorder %s1534_s16, %s1854_s5 }
  0x45   : > { %776 = vmatpush.bf16.msra.mxu3 %v1331_v38  ;;  %p1536_p1 = scmp.ne.s32.totalorder %s1534_s16, %s1535_s13  ;;  %p1541_p2 = scmp.lt.s32.totalorder %s1539_s9, %s1535_s13 }
  0x46   : > { %427 = vmatpush.bf16.msra.mxu0 %v1311_v39  ;;  %v1323_v39 = vld [vmem:[#allocation9 + $0x30] sm:$0xff] }
  0x47   : > { %p1537_p4 = pnand %p1536_p1, %p1697_p3  ;;  %p1542_p9 = por %p1541_p2, %p1540_p11 }
  0x48   : > { %475 = vmatpush.bf16.msra.mxu1 %v1305_v40  ;;  %539 = vmatpush.bf16.msra.mxu2 %v1314_v41  ;;  %v1330_v40 = vld [vmem:[#allocation9 + $0x68] sm:$0xff] }
  0x49   : > { %777 = vmatpush.bf16.msra.mxu3 %v1330_v40  ;;  %v1322_v41 = vld [vmem:[#allocation9 + $0x28] sm:$0xff]  ;;  %p1538_p8 = pneg %p1537_p4 }
  0x4a   : > { %428 = vmatpush.bf16.msra.mxu0 %v1310_v42  ;;  %v1329_v42 = vld [vmem:[#allocation9 + $0x60] sm:$0xff] }
  0x4b   : > { %p1543_p10 = pnand %p1542_p9, %p1538_p8 }
  0x4c   : > { %540 = vmatpush.bf16.msra.mxu2 %v1313_v43  ;;  %859 = vmatpush.bf16.msrb.mxu1 %v1324_v37 }
  0x4d   : > { %778 = vmatpush.bf16.msra.mxu3 %v1329_v42 }
  0x4e   : > { %429 = vmatpush.bf16.msra.mxu0 %v1309_v44  ;;  %v1321_v44 = vld [vmem:[#allocation9 + $0x20] sm:$0xff] }
  0x50   : > { %860 = vmatpush.bf16.msrb.mxu1 %v1323_v39 }
  0x54   : > { %861 = vmatpush.bf16.msrb.mxu1 %v1322_v41 }
  0x58   : > { %862 = vmatpush.bf16.msrb.mxu1 %v1321_v44 }
  0xac   : > { %v328_v46 = vpop.permute.xlu0 %327 }
  0xad   : > { %v342_v47 = vsel %vm340_vm13, %v328_v46, %v341_v45  ;;  %v326_v48 = vpop.permute.xlu1 %325  ;;  %vm576_vm13 = vcmask 57344   ;;  %v563_v45 = vld [vmem:[#allocation3] sm:$0x11] }
  0xae   : > { %343 = vst [vmem:[#allocation2 + $0x8] sm:$0x1] %v342_v47  ;;  %v1328_v46 = vld [vmem:[#allocation9 + $0x58] sm:$0xff] }
  0xaf   : > { %338 = vst.msk [vmem:[#allocation2 + $0x4] sm:$0xf] %vm332_vm14, %v326_v48  ;;  %vm581_vm14 = vcmask 122944   ;;  %779 = vmatpush.bf16.msra.mxu3 %v1328_v46  ;;  %v1320_v48 = vld [vmem:[#allocation9 + $0x18] sm:$0xff] }
  0xb0   : > { %863 = vmatpush.bf16.msrb.mxu1 %v1320_v48 }
  0xb4   : > { %v324_v50 = vpop.permute.xlu0 %323 }
  0xb5   : > { %v335_v51 = vsel %vm333_vm15, %v324_v50, %v334_v49  ;;  %v355_v52 = vld [vmem:[#allocation2 + $0x8] sm:$0x1]  ;;  %vm558_vm15 = vmand %vm557_vm8, %vm280_vm0  ;;  %v1327_v49 = vld [vmem:[#allocation9 + $0x50] sm:$0xff] }
  0xb6   : > { %336 = vst [vmem:[#allocation2] sm:$0xf] %v335_v51  ;;  %v371_v53 = vunpack.c.l.b16 %v355_v52  ;;  %v1349_v55 = vld [vmem:[#allocation2] sm:$0xf0]  ;;  %780 = vmatpush.bf16.msra.mxu3 %v1327_v49  ;;  %v1326_v51 = vld [vmem:[#allocation9 + $0x48] sm:$0xff] }
  0xb7   : > { %v1319_v50 = vld [vmem:[#allocation9 + $0x10] sm:$0xff]  ;;  %v1342_v52 = vld [vmem:[#allocation9 + $0xc8] sm:$0xff] }
  0xb8   : > { %v373_v54 = vpack.c.b16 %v371_v53, %v371_v53  ;;  %864 = vmatpush.bf16.msrb.mxu1 %v1319_v50  ;;  %v1318_v53 = vld [vmem:[#allocation9 + $0x8] sm:$0xff] }
  0xba   : > { %v383_v60 = vshll.u32 %v373_v54, 16  ;;  %v498_v0 = vrot.slane %v373_v54, 1  ;;  %781 = vmatpush.bf16.msra.mxu3 %v1326_v51  ;;  %v1341_v54 = vld [vmem:[#allocation9 + $0xc0] sm:$0xff] }
  0xbc   : > { %v385_v3 = vrot.slane %v383_v60, 1  ;;  %865 = vmatpush.bf16.msrb.mxu1 %v1318_v53  ;;  %v1343_v60 = vld [vmem:[#allocation9 + $0xd0] sm:$0xff] }
  0xbd   : > { %v1346_v56 = vld [vmem:[#allocation2] sm:$0xff]  }
  0xbe   : > { %v1350_v57 = vld [vmem:[#allocation2] sm:$0xe]  ;;  %v378_v58 = vshll.u32 %v1346_v56, 16  ;;  %1170 = vmatmul.msk.bf16.vlgmr.msra.gmra.mxu1 %vm414_vm1, %v1346_v56  ;;  %v376_v61 = vshrl.u32 %v1346_v56, 16  ;;  %976 = vmatpush.bf16.msrb.mxu3 %v1342_v52  ;;  %v1325_v56 = vld [vmem:[#allocation9 + $0x40] sm:$0xff] }
  0xbf   : > { %v1351_v59 = vor.u32 %v1350_v57, %v1349_v55  ;;  %v1317_v55 = vld [vmem:[#allocation9] sm:$0xff]  ;;  %v1334_v57 = vld [vmem:[#allocation9 + $0x88] sm:$0xff]  ;;  %880 = vmatpush.bf16.msrb.mxu2 %v1325_v56 }
  0xc0   : > { %v380_v62 = vrot.slane %v378_v58, 1  ;;  %866 = vmatpush.bf16.msrb.mxu1 %v1317_v55  ;;  %795 = vmatpush.bf16.msrb.mxu0 %v1334_v57  ;;  %v1340_v58 = vld [vmem:[#allocation9 + $0xb8] sm:$0xff] }
  0xc1   : > { %v497_v63 = vrot.slane %v1351_v59, 1  ;;  %v1338_v59 = vld [vmem:[#allocation9 + $0xa8] sm:$0xff] }
  0xc2   : > { %v381_v1 = vor.u32 %v380_v62, %v376_v61  ;;  %977 = vmatpush.bf16.msrb.mxu3 %v1341_v54  ;;  %v1337_v62 = vld [vmem:[#allocation9 + $0xa0] sm:$0xff] }
  0xc3   : > { %v499_v2 = vsel %vm1855_vm2, %v497_v63, %v498_v0 }
  0xc4   : > { %1187 = vmatmul.msk.bf16.vlgmr.msra.gmra.mxu2 %vm414_vm1, %v499_v2  ;;  %v386_v4 = vsel %vm1856_vm4, %v381_v1, %v385_v3  ;;  %v1336_v1 = vld [vmem:[#allocation9 + $0x98] sm:$0xff]  ;;  %v1335_v3 = vld [vmem:[#allocation9 + $0x90] sm:$0xff] }
  0xc5   : > { %1153 = vmatmul.msk.bf16.vlgmr.msra.gmra.mxu0 %vm414_vm1, %v386_v4  ;;  %vm560_vm1 = vsmask.f32 4352 }
  0xc6   : > { %vm561_vm2 = vmand %vm559_vm9, %vm560_vm1  ;;  %978 = vmatpush.bf16.msrb.mxu3 %v1340_v58  ;;  %997 = vmatpush.bf16.msra.mxu0 %v1343_v60  ;;  %vm632_vm9 = vcmask 61444  }
  0xc7   : > { %vm562_vm4 = vmor %vm561_vm2, %vm558_vm15  ;;  %vm618_vm2 = vcmask 1043520  }
  0xc8   : > { %v564_v47 = vsel %vm562_vm4, 0, %v563_v45  ;;  %vm620_vm4 = vcmask 64516  }
  0xc9   : > { %565 = vst [vmem:[#allocation3] sm:$0x11] %v564_v47 }
  0xca   : > { %574 = vst.msk [vmem:[#allocation3] sm:$0xf] %vm573_vm6, %v1598_v22  ;;  %vm611_vm6 = vcmask 64512  }
  0xcb   : > { %579 = vst.msk [vmem:[#allocation3 + $0x4] sm:$0xf] %vm578_vm7, %v1598_v22  ;;  %vm628_vm7 = vmor %vm620_vm4, %vm618_vm2 }
 0x13b   : > { %v477_v5 = vpop.f32.mrf.mxu1 }
 0x142   : > { %v431_v6 = vpop.f32.mrf.mxu0 }
 0x143   : > { %v478_v7 = vadd.f32 %v477_v5, %v431_v6  ;;  %v479_v17 = vpop.f32.mrf.mxu1 }
 0x147   : > { %v542_v9 = vpop.f32.mrf.mxu2 }
 0x148   : > { %v547_v11 = vadd.f32 %v542_v9, %v478_v7  ;;  %v623_v9 = vld [vmem:[#allocation3] sm:$0xff] }
 0x14a   : > { %v553_v14 = vadd.f32 %v1427_v8, %v547_v11  ;;  %v433_v15 = vpop.f32.mrf.mxu0 }
 0x14b   : > { %v480_v19 = vadd.f32 %v479_v17, %v433_v15 }
 0x14c   : > { %v555_v16 = vmax.f32 %v553_v14, 0.0 }
 0x14e   : > { %v583_v18 = vpack.c.bf16 %v555_v16, %v555_v16 }
 0x14f   : > { %v544_v20 = vpop.f32.mrf.mxu2 }
 0x150   : > { %v586_v21 = vshrl.u32 %v583_v18, 16  ;;  %v548_v23 = vadd.f32 %v544_v20, %v480_v19  ;;  %v589_v24 = vshll.u32 %v583_v18, 16 }
 0x152   : > { %v554_v25 = vadd.f32 %v1427_v8, %v548_v23  ;;  %v588_v26 = vrot.slane %v586_v21, 7 }
 0x154   : > { %v556_v27 = vmax.f32 %v554_v25, 0.0  ;;  %v591_v28 = vor.u32 %v589_v24, %v588_v26  ;;  %v592_v33 = vrot.slane %v588_v26, 4 }
 0x156   : > { %v584_v29 = vpack.c.bf16 %v556_v27, %v556_v27  ;;  %602 = vrot.lane.b32.xlu1 %v591_v28, %s1599_s10 }
 0x158   : > { %v594_v30 = vshrl.u32 %v584_v29, 16  ;;  %v597_v32 = vshll.u32 %v584_v29, 16 }
 0x15a   : > { %v596_v31 = vrot.slane %v594_v30, 7 }
 0x15c   : > { %v599_v34 = vor.u32 %v597_v32, %v596_v31  ;;  %v601_v36 = vrot.slane %v596_v31, 4 }
 0x15e   : > { %v600_v35 = vsel %vm1742_vm3, %v592_v33, %v599_v34  ;;  %vm566_vm3 = vmand %vm557_vm8, %vm285_vm5  ;;  %vm630_vm8 = vcmask 1040448  }
 0x15f   : > { %604 = vrot.lane.b32.xlu2 %v600_v35, %s1599_s10  ;;  %vm569_vm12 = vmor %vm568_vm11, %vm566_vm3 }
 0x160   : > { %v571_v43 = vsel %vm569_vm12, 0, %v570_v12  ;;  %vm631_vm3 = vmand %vm630_vm8, %vm280_vm0 }
 0x161   : > { %572 = vst [vmem:[#allocation3 + $0x10] sm:$0x11] %v571_v43  ;;  %vm633_vm11 = vmand %vm632_vm9, %vm560_vm1  ;;  %vm1866_vm1 = vcmask 1046528  }
 0x162   : > { %577 = vst.msk [vmem:[#allocation3 + $0x10] sm:$0x1] %vm576_vm13, %v1598_v22  ;;  %vm634_vm12 = vmor %vm633_vm11, %vm631_vm3 }
 0x163   : > { %582 = vst.msk [vmem:[#allocation3 + $0x14] sm:$0x1] %vm581_vm14, %v1598_v22  ;;  %v1339_v22 = vld [vmem:[#allocation9 + $0xb0] sm:$0xff]  ;;  %vm619_vm13 = vmand %vm618_vm2, %vm285_vm5  ;;  %vm770_vm5 = vcmask 130048  }
 0x164   : > { %979 = vmatpush.bf16.msrb.mxu3 %v1339_v22  ;;  %vm621_vm14 = vmand %vm620_vm4, %vm567_vm10  ;;  %vm1864_vm10 = vsmask.f32 7424 }
 0x165   : > { %vm622_vm0 = vmor %vm621_vm14, %vm619_vm13 }
 0x166   : > { %vm1865_vm15 = vmmov %vm1864_vm10 }
 0x167   : > { %606 = vrot.lane.b32.xlu2 %v601_v36, %s1599_s10  ;;  %vm1867_vm2 = vmmov %vm1866_vm1 }
 0x168   : > { %980 = vmatpush.bf16.msrb.mxu3 %v1338_v59 }
 0x16a   : > { %v635_v4 = vld [vmem:[#allocation3 + $0x10] sm:$0x11] }
 0x16c   : > { %981 = vmatpush.bf16.msrb.mxu3 %v1337_v62 }
 0x170   : > { %982 = vmatpush.bf16.msrb.mxu3 %v1336_v1 }
 0x174   : > { %983 = vmatpush.bf16.msrb.mxu3 %v1335_v3 }
 0x1b9   : > { %v605_v61 = vpop.permute.xlu2 %604 }
 0x1ba   : > { %v609_v63 = vrot.slane %v605_v61, 4 }
 0x1bc   : > { %v613_v0 = vsel %vm611_vm6, %v609_v63, %v605_v61  ;;  %v1428_v63 = vld [vmem:[%s1853_s4] ss:$0 sm:$0xff] }
 0x1bd   : > { %629 = vst.msk [vmem:[#allocation3 + $0x8] sm:$0xff] %vm628_vm7, %v613_v0 }
 0x1c1   : > { %v607_v2 = vpop.permute.xlu2 %606 }
 0x1c2   : > { %v610_v5 = vrot.slane %v607_v2, 4 }
 0x1c4   : > { %v614_v6 = vsel %vm611_vm6, %v610_v5, %v607_v2  ;;  %v639_v11 = vld [vmem:[#allocation3 + $0x8] sm:$0xff] }
 0x1c5   : > { %v636_v7 = vsel %vm634_vm12, %v614_v6, %v635_v4  ;;  %v683_v17 = vunpack.c.l.b16 %v639_v11  ;;  %v684_v18 = vunpack.c.h.b16 %v639_v11 }
 0x1c6   : > { %637 = vst [vmem:[#allocation3 + $0x10] sm:$0x11] %v636_v7 }
 0x1c8   : > { %v603_v8 = vpop.permute.xlu1 %602 }
 0x1c9   : > { %v608_v10 = vrot.slane %v603_v8, 4 }
 0x1cb   : > { %v612_v13 = vsel %vm611_vm6, %v608_v10, %v603_v8 }
 0x1cc   : > { %v624_v14 = vsel %vm622_vm0, %v612_v13, %v623_v9 }
 0x1cd   : > { %625 = vst [vmem:[#allocation3] sm:$0xff] %v624_v14  ;;  %v681_v15 = vunpack.c.l.b16 %v624_v14  ;;  %v682_v16 = vunpack.c.h.b16 %v624_v14  ;;  %v658_v19 = vld [vmem:[#allocation3 + $0x10] sm:$0x11] }
 0x1ce   : > { %v685_v20 = vunpack.c.l.b16 %v658_v19  ;;  %v686_v21 = vunpack.c.h.b16 %v658_v19 }
 0x1cf   : > { %v687_v23 = vpack.c.b16 %v683_v17, %v681_v15  ;;  %v688_v24 = vpack.c.b16 %v684_v18, %v682_v16 }
 0x1d0   : > { %v689_v25 = vpack.c.b16 %v685_v20, %v685_v20  ;;  %v690_v26 = vpack.c.b16 %v686_v21, %v686_v21 }
 0x1d1   : > { %867 = vmatmul.bf16.vlgmr.msrb.gmra.mxu1 %v687_v23  ;;  %1261 = vmatmul.msk.bf16.vlgmr.msrb.gmra.mxu2 %vm770_vm5, %v688_v24  ;;  %v694_v27 = vshll.u32 %v687_v23, 16  ;;  %v706_v28 = vshll.u32 %v688_v24, 16  ;;  %v692_v31 = vshrl.u32 %v687_v23, 16  ;;  %v704_v33 = vshrl.u32 %v688_v24, 16 }
 0x1d2   : > { %v699_v29 = vshll.u32 %v689_v25, 16  ;;  %v711_v30 = vshll.u32 %v690_v26, 16  ;;  %v913_v47 = vrot.slane %v689_v25, 1  ;;  %v916_v48 = vrot.slane %v690_v26, 1 }
 0x1d3   : > { %v696_v32 = vrot.slane %v694_v27, 1  ;;  %v708_v34 = vrot.slane %v706_v28, 1 }
 0x1d4   : > { %v701_v35 = vrot.slane %v699_v29, 1  ;;  %v713_v36 = vrot.slane %v711_v30, 1  ;;  %v887_v41 = vld [vmem:[#allocation3] sm:$0xee] }
 0x1d5   : > { %v697_v37 = vor.u32 %v696_v32, %v692_v31  ;;  %v709_v38 = vor.u32 %v708_v34, %v704_v33  ;;  %v908_v12 = vunpack.c.l.b16 %v887_v41  ;;  %v909_v42 = vunpack.c.h.b16 %v887_v41 }
 0x1d7   : > { %v702_v39 = vsel %vm1864_vm10, %v697_v37, %v701_v35  ;;  %v714_v40 = vsel %vm1865_vm15, %v709_v38, %v713_v36  ;;  %v910_v43 = vpack.c.b16 %v683_v17, %v908_v12  ;;  %v911_v44 = vpack.c.b16 %v684_v18, %v909_v42 }
 0x1d8   : > { %782 = vmatmul.bf16.vlgmr.msra.gmra.mxu3 %v702_v39  ;;  %1224 = vmatmul.msk.bf16.vlgmr.msrb.gmra.mxu0 %vm770_vm5, %v714_v40 }
 0x1d9   : > { %v912_v45 = vrot.slane %v910_v43, 1  ;;  %v915_v46 = vrot.slane %v911_v44, 1 }
 0x1db   : > { %v914_v49 = vsel %vm1866_vm1, %v912_v45, %v913_v47  ;;  %v917_v50 = vsel %vm1867_vm2, %v915_v46, %v916_v48 }
 0x1e8   : > { %984 = vmatmul.bf16.vlgmr.msrb.gmra.mxu3 %v914_v49  ;;  %1298 = vmatmul.msk.bf16.vlgmr.msra.gmra.mxu0 %vm770_vm5, %v917_v50 }
 0x24e   : > { %v868_v56 = vpop.f32.mrf.mxu1 }
 0x254   : > { %v882_v57 = vpop.f32.mrf.mxu2 }
 0x255   : > { %v797_v51 = vpop.f32.mrf.mxu0 }
 0x256   : > { %v870_v1 = vpop.f32.mrf.mxu1 }
 0x25b   : > { %v783_v52 = vpop.f32.mrf.mxu3 }
 0x25c   : > { %v798_v55 = vadd.f32 %v797_v51, %v783_v52  ;;  %v884_v4 = vpop.f32.mrf.mxu2 }
 0x25d   : > { %v799_v53 = vpop.f32.mrf.mxu0 }
 0x25e   : > { %v869_v58 = vadd.f32 %v868_v56, %v798_v55 }
 0x260   : > { %v883_v61 = vadd.f32 %v882_v57, %v869_v58 }
 0x263   : > { %v785_v54 = vpop.f32.mrf.mxu3 }
 0x264   : > { %v800_v60 = vadd.f32 %v799_v53, %v785_v54 }
 0x265   : > { %v999_v22 = vpop.f32.mrf.mxu0 }
 0x266   : > { %v871_v2 = vadd.f32 %v870_v1, %v800_v60 }
 0x268   : > { %v885_v8 = vadd.f32 %v884_v4, %v871_v2 }
 0x26b   : > { %v985_v59 = vpop.f32.mrf.mxu3 }
 0x26c   : > { %v1000_v62 = vadd.f32 %v999_v22, %v985_v59 }
 0x26d   : > { %v1001_v6 = vpop.f32.mrf.mxu0 }
 0x26e   : > { %v1004_v0 = vadd.f32 %v1000_v62, %v883_v61 }
 0x270   : > { %v1010_v3 = vadd.f32 %v1428_v63, %v1004_v0 }
 0x272   : > { %v1012_v5 = vmax.f32 %v1010_v3, 0.0 }
 0x273   : > { %v987_v7 = vpop.f32.mrf.mxu3 }
 0x274   : > { %1014 = vst [vmem:[%s277_s28] sm:$0xff] %v1012_v5  ;;  %v1002_v9 = vadd.f32 %v1001_v6, %v987_v7 }
 0x276   : > { %v1005_v10 = vadd.f32 %v1002_v9, %v885_v8 }
 0x278   : > { %v1011_v11 = vadd.f32 %v1428_v63, %v1005_v10 }
 0x27a   : > { %v1013_v13 = vmax.f32 %v1011_v11, 0.0 }
 0x27c   : > { %1015 = vst [vmem:[%s277_s28 + $0x8] sm:$0xff] %v1013_v13 }
 0x27d   : > { %1546 = shalt.err (!%p1543_p10)
}
 0x27e   : > { %s1600_s8 = smov 128  }
 0x27f   : > { %1362 = dma.vmem_to_hbm [thread:$0]  (%p1697_p3), %s1030_s7, 256, %s1032_s15, %s1017_s22, %s1600_s8, %s1600_s8, %s1599_s10  }
 0x280 PF: > { %s1046_s27 = sand.u32 1, %s1577_s18   ;;  %p1868_p12 = scmp.ge.s32.totalorder %s1589_s21, 2 }
 0x281   : > { %s1047_s28 = scalar_lea.sflag [#allocation6], %s1046_s27 }
 0x282   : > { %p1376_p13 = pnand %p1868_p12, %p1666_p6 }
 0x284   : > { %p1377_p0 = pneg %p1376_p13 }
 0x286   : > { %1572 = dma.done.wait (%p1377_p0), %s1047_s28, 256  }
 0x287   : > { %1574 = vsyncadd (%p1377_p0), %s1047_s28, 4294967040  ;;  %p19_p5 = scmp.ge.s32.totalorder %s1687_s14, 4   ;;  %s1869_s18 = smov %s1581_s19 }
 0x288   : > { %s1870_s19 = smov %s1585_s20  ;;  %s1871_s20 = smov %s1703_s23 }
 0x289   : > { %s1872_s21 = smov %s1687_s14  ;;  %21 = sbr.rel (!%p19_p5) target bundleno = 6 (0x6), region = 97 }
 0x28e   :  { %1053 = vsyncpa [#allocation5], 1 }
 0x28f   :  { %1055 = vsyncpa [#allocation5 + $0x1], 1 }
 0x290   :  { %1056 = vsyncpa [#allocation8], 1 }
 0x291   :  { %1057 = vsyncpa [#allocation6], 1 }
 0x292   :  { %1059 = vsyncpa [#allocation6 + $0x1], 1 }

</bundles_post_ra>
